<compile_context>
chip_gen: v6e
topology: v6e:2x2x1
jax: 0.10.0
libtpu: 0.0.40
codegen_flags: <defaults>
</compile_context>

<pallas_src>
import functools

import jax
import jax.numpy as jnp
from jax.experimental import pallas as pl
from jax.experimental.pallas import tpu as pltpu

# Scoped-VMEM budget: generous for these sizes, still leaves headroom under
# v7x's 64 MiB/TC physical VMEM (<= defaults-compatible on v5e/v6e too).
_VMEM_LIMIT = 48 * 1024 * 1024


def _round_up(n, m):
    return ((n + m - 1) // m) * m


def _largest_divisor_leq(n, k):
    k = min(n, k)
    while n % k:
        k -= 1
    return k


# ----------------------------- in-kernel math -----------------------------

def _gelu(x):
    # tanh-approximate GELU: routes to the EUP slot instead of a long VALU
    # chain (differs from torch's exact-erf nn.GELU by ~1e-3 max).
    c0 = 0.7978845608028654            # sqrt(2/pi)
    return 0.5 * x * (1.0 + jnp.tanh(c0 * (x + 0.044715 * (x * x * x))))


def _layernorm(x, g, b, eps):
    mu = jnp.mean(x, axis=-1, keepdims=True)
    xc = x - mu
    var = jnp.mean(xc * xc, axis=-1, keepdims=True)
    return xc * jax.lax.rsqrt(var + eps) * g + b


def _vit_block(x, ln1g, ln1b, wqkv, bqkv, wproj, bproj,
               ln2g, ln2b, wfc1, bfc1, wfc2, bfc2, *, num_heads, eps):
    """One pre-norm ViT block on a (Bt, T, D) slab (f32 residual stream).

    QKV: one fused lane-dense (Bt*T, D) @ (D, 3D) bf16 matmul (attention scale
    pre-folded into the q columns).  Output projection: one (Bt*T, D) @ (D, D)
    matmul.  Only scores/softmax/PV are per-(batch, head), from static column
    slices of the fused qkv activation.
    """
    Bt, T, D = x.shape
    hd = D // num_heads
    bf16 = jnp.bfloat16

    x2 = x.reshape(Bt * T, D)

    # ---- attention branch: x + proj(MHSA(LN1(x))) ----
    xn = _layernorm(x2, ln1g, ln1b, eps)
    qkv = jnp.dot(xn.astype(bf16), wqkv,
                  preferred_element_type=jnp.float32) + bqkv      # (Bt*T, 3D)
    qkv = qkv.reshape(Bt, T, 3 * D)

    outs = []
    for b in range(Bt):                       # static unroll, Bt small
        head_outs = []
        for h in range(num_heads):
            q = qkv[b, :, h * hd:(h + 1) * hd]                     # (T, hd)
            k = qkv[b, :, D + h * hd:D + (h + 1) * hd]
            v = qkv[b, :, 2 * D + h * hd:2 * D + (h + 1) * hd]
            # q @ k.T without an explicit transpose (contract dim 1 vs 1)
            s = jax.lax.dot_general(q.astype(bf16), k.astype(bf16),
                                    (((1,), (1,)), ((), ())),
                                    preferred_element_type=jnp.float32)  # (T,T)
            s = s - jnp.max(s, axis=-1, keepdims=True)
            p = jnp.exp(s)
            p = p * pl.reciprocal(jnp.sum(p, axis=-1, keepdims=True),
                                  approx=True)
            head_outs.append(jnp.dot(p.astype(bf16), v.astype(bf16),
                                     preferred_element_type=jnp.float32))
        outs.append(jnp.concatenate(head_outs, axis=-1))            # (T, D)
    o = jnp.concatenate(outs, axis=0)                               # (Bt*T, D)

    attn = jnp.dot(o.astype(bf16), wproj,
                   preferred_element_type=jnp.float32) + bproj
    x2 = x2 + attn

    # ---- MLP branch: x + fc2(GELU(fc1(LN2(x)))) ----
    xn2 = _layernorm(x2, ln2g, ln2b, eps)
    h1 = _gelu(jnp.dot(xn2.astype(bf16), wfc1,
                       preferred_element_type=jnp.float32) + bfc1)
    h2 = jnp.dot(h1.astype(bf16), wfc2,
                 preferred_element_type=jnp.float32) + bfc2
    return (x2 + h2).reshape(Bt, T, D)


# ----------------------------- Pallas kernels -----------------------------

def _layer_step(x_ref, x_scr, ln1g, ln1b, wqkv, bqkv, wproj, bproj,
                ln2g, ln2b, wfc1, bfc1, wfc2, bfc2, num_heads, eps):
    """One grid step = one transformer layer on the residual in x_scr."""
    @pl.when(pl.program_id(1) == 0)
    def _():
        x_scr[...] = x_ref[...]                 # load input at first layer

    x = _vit_block(x_scr[...], ln1g[0], ln1b[0], wqkv[0], bqkv[0], wproj[0],
                   bproj[0], ln2g[0], ln2b[0], wfc1[0], bfc1[0], wfc2[0],
                   bfc2[0], num_heads=num_heads, eps=eps)
    x_scr[...] = x
    return x


def _enc_stack_kernel(x_ref, ln1g, ln1b, wqkv, bqkv, wproj, bproj,
                      ln2g, ln2b, wfc1, bfc1, wfc2, bfc2, ng, nb,
                      o_ref, x_scr, *, num_heads, eps):
    x = _layer_step(x_ref, x_scr, ln1g, ln1b, wqkv, bqkv, wproj, bproj,
                    ln2g, ln2b, wfc1, bfc1, wfc2, bfc2, num_heads, eps)

    @pl.when(pl.program_id(1) == pl.num_programs(1) - 1)
    def _():
        Bt, T, D = x.shape
        xn = _layernorm(x.reshape(Bt * T, D), ng[...], nb[...], eps)
        o_ref[...] = xn.reshape(Bt, T, D)       # fused final encoder LN


def _dec_stack_kernel(x_ref, ln1g, ln1b, wqkv, bqkv, wproj, bproj,
                      ln2g, ln2b, wfc1, bfc1, wfc2, bfc2,
                      o_ref, x_scr, *, num_heads, eps):
    x = _layer_step(x_ref, x_scr, ln1g, ln1b, wqkv, bqkv, wproj, bproj,
                    ln2g, ln2b, wfc1, bfc1, wfc2, bfc2, num_heads, eps)

    @pl.when(pl.program_id(1) == pl.num_programs(1) - 1)
    def _():
        o_ref[...] = x


_W_ORDER = ('ln1_g', 'ln1_b', 'w_qkv', 'b_qkv', 'w_proj', 'b_proj',
            'ln2_g', 'ln2_b', 'w_fc1', 'b_fc1', 'w_fc2', 'b_fc2')


def vit_stack_pallas(x, stacked, num_heads, *, final_ln=None, eps=1e-5,
                     bt_target=4):
    """x: (B, T, D) f32.  All L pre-norm ViT blocks fused in one pallas_call.

    Grid (B//bt, L): batch "parallel", layer "arbitrary" (per-layer weights
    streamed + double-buffered; residual carried in VMEM scratch).
    final_ln=(g, b): fuse a trailing LayerNorm (encoder) -> (B, T, D).
    """
    B, T, D = x.shape
    L = stacked['w_fc1'].shape[0]
    bt = _largest_divisor_leq(B, bt_target)

    w_args = [stacked[k] for k in _W_ORDER]                 # each (L, r, c)
    w_specs = [pl.BlockSpec((1,) + a.shape[1:], lambda b, l: (l, 0, 0))
               for a in w_args]

    in_specs = [pl.BlockSpec((bt, T, D), lambda b, l: (b, 0, 0))] + w_specs
    extra = []
    if final_ln is not None:
        g, bb = final_ln
        extra = [g.reshape(1, D), bb.reshape(1, D)]
        in_specs += [pl.BlockSpec((1, D), lambda b, l: (0, 0)),
                     pl.BlockSpec((1, D), lambda b, l: (0, 0))]
        kern = functools.partial(_enc_stack_kernel, num_heads=num_heads,
                                 eps=eps)
    else:
        kern = functools.partial(_dec_stack_kernel, num_heads=num_heads,
                                 eps=eps)

    return pl.pallas_call(
        kern,
        out_shape=jax.ShapeDtypeStruct((B, T, D), jnp.float32),
        grid=(B // bt, L),
        in_specs=in_specs,
        out_specs=pl.BlockSpec((bt, T, D), lambda b, l: (b, 0, 0)),
        scratch_shapes=[pltpu.VMEM((bt, T, D), jnp.float32)],
        compiler_params=pltpu.CompilerParams(
            dimension_semantics=("parallel", "arbitrary"),
            vmem_limit_bytes=_VMEM_LIMIT),
    )(x, *w_args, *extra)


def _linear_kernel(x_ref, w_ref, b_ref, o_ref):
    o_ref[...] = (jnp.dot(x_ref[...].astype(jnp.bfloat16), w_ref[...],
                          preferred_element_type=jnp.float32) + b_ref[...])


def linear_pallas(x, w, b, *, tm=512):
    """(M, K) @ (K, N) + (N,) -> (M, N) f32, row-tiled (bf16 MXU, f32 acc).

    Ragged M is padded to a tile multiple (not collapsed into one huge block).
    """
    M, K = x.shape
    N = w.shape[1]
    if M <= tm:
        tm = _round_up(M, 8)               # single block, no padding waste
    Mp = _round_up(M, tm)
    xp = jnp.pad(x, ((0, Mp - M), (0, 0))) if Mp != M else x
    out = pl.pallas_call(
        _linear_kernel,
        out_shape=jax.ShapeDtypeStruct((Mp, N), jnp.float32),
        grid=(Mp // tm,),
        in_specs=[pl.BlockSpec((tm, K), lambda i: (i, 0)),
                  pl.BlockSpec((K, N), lambda i: (0, 0)),
                  pl.BlockSpec((1, N), lambda i: (0, 0))],
        out_specs=pl.BlockSpec((tm, N), lambda i: (i, 0)),
        compiler_params=pltpu.CompilerParams(
            dimension_semantics=("parallel",),
            vmem_limit_bytes=_VMEM_LIMIT),
    )(xp, w.astype(jnp.bfloat16), b.reshape(1, N))
    return out[:M] if Mp != M else out


# ----------------------------- plain-JAX glue -----------------------------

def take_indexes(seq, idx):
    """seq: (B, T, C), idx: (B, T') -> out[b, t, :] = seq[b, idx[b, t], :]."""
    idx3 = jnp.broadcast_to(idx[:, :, None], idx.shape + (seq.shape[-1],))
    return jnp.take_along_axis(seq, idx3, axis=1)


def patchify(img, p):
    """NCHW image -> (B, num_patches, C*p*p), (c, p1, p2) feature order and
    h-major token order (matches Conv2d(kernel=stride=p) + '(h w) b c')."""
    B, C, H, W = img.shape
    x = img.reshape(B, C, H // p, p, W // p, p)
    x = x.transpose(0, 2, 4, 1, 3, 5)              # b, h, w, c, p1, p2
    return x.reshape(B, (H // p) * (W // p), C * p * p)


def patch2img(x, h, w, c, p):
    """'(h w) b (c p1 p2) -> b c (h p1) (w p2)' in batch-major form."""
    B = x.shape[0]
    x = x.reshape(B, h, w, c, p, p)
    x = x.transpose(0, 3, 1, 4, 2, 5)              # b, c, h, p1, w, p2
    return x.reshape(B, c, h * p, w * p)


# ----------------------------- parameters -----------------------------

def _init_block(key, D):
    H = 4 * D
    ks = jax.random.split(key, 4)
    std = 0.02
    return dict(
        ln1_g=jnp.ones((D,), jnp.float32), ln1_b=jnp.zeros((D,), jnp.float32),
        w_qkv=jax.random.normal(ks[0], (D, 3 * D), jnp.float32) * std,
        b_qkv=jnp.zeros((3 * D,), jnp.float32),
        w_proj=jax.random.normal(ks[1], (D, D), jnp.float32) * std,
        b_proj=jnp.zeros((D,), jnp.float32),
        ln2_g=jnp.ones((D,), jnp.float32), ln2_b=jnp.zeros((D,), jnp.float32),
        w_fc1=jax.random.normal(ks[2], (D, H), jnp.float32) * std,
        b_fc1=jnp.zeros((H,), jnp.float32),
        w_fc2=jax.random.normal(ks[3], (H, D), jnp.float32) * std,
        b_fc2=jnp.zeros((D,), jnp.float32),
    )


def _stack_blocks(blocks, D, num_heads):
    """Stack per-layer params on a leading (L,) axis for layer streaming.
    q/k/v stay fused as one (D, 3D) lane-dense projection; the 1/sqrt(hd)
    attention scale is folded into the q columns.  Matmul weights -> bf16."""
    L = len(blocks)
    hd = D // num_heads
    scale = float(hd) ** -0.5
    bf16 = jnp.bfloat16

    def cat(key):
        return jnp.stack([blk[key] for blk in blocks], axis=0)

    qscale = jnp.concatenate([jnp.full((D,), scale, jnp.float32),
                              jnp.ones((2 * D,), jnp.float32)])
    w_qkv = cat('w_qkv') * qscale[None, None, :]               # (L, D, 3D)
    b_qkv = cat('b_qkv') * qscale[None, :]                     # (L, 3D)

    return dict(
        ln1_g=cat('ln1_g').reshape(L, 1, D),
        ln1_b=cat('ln1_b').reshape(L, 1, D),
        w_qkv=w_qkv.astype(bf16),
        b_qkv=b_qkv.reshape(L, 1, 3 * D),
        w_proj=cat('w_proj').astype(bf16),
        b_proj=cat('b_proj').reshape(L, 1, D),
        ln2_g=cat('ln2_g').reshape(L, 1, D),
        ln2_b=cat('ln2_b').reshape(L, 1, D),
        w_fc1=cat('w_fc1').astype(bf16),
        b_fc1=cat('b_fc1').reshape(L, 1, 4 * D),
        w_fc2=cat('w_fc2').astype(bf16),
        b_fc2=cat('b_fc2').reshape(L, 1, D),
    )


def init_params(key, D, enc_layers, dec_layers, num_heads, patch, img_size,
                mask_ratio):
    num_patch = (img_size // patch) ** 2
    in_dim = 3 * patch * patch
    ks = jax.random.split(key, 6 + enc_layers + dec_layers)
    std = 0.02
    enc_blocks = [_init_block(ks[6 + i], D) for i in range(enc_layers)]
    dec_blocks = [_init_block(ks[6 + enc_layers + i], D)
                  for i in range(dec_layers)]
    enc = dict(
        patch_w=jax.random.normal(ks[0], (in_dim, D), jnp.float32) * std,
        patch_b=jnp.zeros((D,), jnp.float32),
        emd_pos=jax.random.normal(ks[1], (1, num_patch, D), jnp.float32) * std,
        cls_token=jax.random.normal(ks[2], (1, 1, D), jnp.float32) * std,
        norm_g=jnp.ones((D,), jnp.float32),
        norm_b=jnp.zeros((D,), jnp.float32),
        stack=_stack_blocks(enc_blocks, D, num_heads),
    )
    dec = dict(
        token_masked=jax.random.normal(ks[3], (1, 1, D), jnp.float32) * std,
        emd_pos=jax.random.normal(ks[4], (1, num_patch + 1, D),
                                  jnp.float32) * std,
        head_w=jax.random.normal(ks[5], (D, 3 * patch * patch),
                                 jnp.float32) * std,
        head_b=jnp.zeros((3 * patch * patch,), jnp.float32),
        stack=_stack_blocks(dec_blocks, D, num_heads),
    )
    return dict(enc=enc, dec=dec, patch_size=patch, num_heads=num_heads,
                mask_ratio=mask_ratio)


# ----------------------------- forward pass -----------------------------

def encoder_forward(params, img, shuffle_key):
    B = img.shape[0]
    p = params['patch_size']
    num_heads = params['num_heads']
    D = params['enc']['patch_w'].shape[1]

    patches_flat = patchify(img, p)                        # (B, T, C*p*p)
    T = patches_flat.shape[1]
    emb = linear_pallas(patches_flat.reshape(B * T, -1),
                        params['enc']['patch_w'], params['enc']['patch_b'])
    patches = emb.reshape(B, T, D) + params['enc']['emd_pos']

    # ImageRandom shuffle: per-batch random permutation (pure-JAX glue).
    keys = jax.random.split(shuffle_key, B)
    fwd = jax.vmap(lambda k: jax.random.permutation(k, T))(keys)
    fwd = fwd.astype(jnp.int32)                            # (B, T)
    bwd = jnp.argsort(fwd, axis=1).astype(jnp.int32)       # backward idx
    remain = int(T * (1.0 - params['mask_ratio']))
    vis = take_indexes(patches, fwd[:, :remain])           # (B, remain, D)

    cls = jnp.broadcast_to(params['enc']['cls_token'], (B, 1, D))
    toks = jnp.concatenate([cls, vis], axis=1)             # (B, remain+1, D)

    feats = vit_stack_pallas(toks, params['enc']['stack'], num_heads,
                             final_ln=(params['enc']['norm_g'],
                                       params['enc']['norm_b']))
    return feats, bwd


def decoder_forward(params, feats, b_index):
    B, t_vis, D = feats.shape
    p = params['patch_size']
    num_heads = params['num_heads']
    num_patch = params['dec']['emd_pos'].shape[1] - 1

    idx = jnp.concatenate(
        [jnp.zeros((B, 1), b_index.dtype), b_index + 1], axis=1)    # (B, T+1)
    mask_tok = jnp.broadcast_to(params['dec']['token_masked'],
                                (B, idx.shape[1] - t_vis, D))
    feat = jnp.concatenate([feats, mask_tok], axis=1)               # (B,T+1,D)
    feat = take_indexes(feat, idx)
    feat = feat + params['dec']['emd_pos']

    out = vit_stack_pallas(feat, params['dec']['stack'], num_heads)  # (B,T+1,D)
    tok = out[:, 1:, :]                                    # drop cls -> (B,T,D)
    Tn = tok.shape[1]
    out_dim = params['dec']['head_w'].shape[1]
    # TODO(synk): fuse the head into _dec_stack_kernel when 3*p*p >= 128
    # (lane-dense); at p=2 (out_dim=12) the fused write would be 90% masked.
    patch = linear_pallas(tok.reshape(B * Tn, D),
                          params['dec']['head_w'],
                          params['dec']['head_b']).reshape(B, Tn, out_dim)

    # Reference does mask[feat.shape[0]:] = 1, an empty slice after the cls
    # token is dropped -> mask stays all zeros (reproduced faithfully).
    mask = jnp.zeros_like(patch)

    h = int(round(num_patch ** 0.5))
    pred_img = patch2img(patch, h, h, 3, p)
    mask_img = patch2img(mask, h, h, 3, p)
    return pred_img, mask_img


def mae_forward(params, img, shuffle_key):
    feats, b_idx = encoder_forward(params, img, shuffle_key)
    return decoder_forward(params, feats, b_idx)


if __name__ == "__main__":
    key = jax.random.PRNGKey(0)
    k_img, k_par, k_shuf = jax.random.split(key, 3)

    # Small shapes consistent with the module: image must be 3x32x32 with
    # patch_size=2 (patch2img hard-codes h=16, p1=p2=2); shrink width/depth.
    B, C, S = 2, 3, 32
    D, heads = 48, 3
    enc_layers, dec_layers = 2, 2
    patch = 2
    mask_ratio = 0.75

    params = init_params(k_par, D, enc_layers, dec_layers, heads, patch, S,
                         mask_ratio)
    img = jax.random.normal(k_img, (B, C, S, S), jnp.float32)

    pred, mask = mae_forward(params, img, k_shuf)
    jax.block_until_ready((pred, mask))
    assert pred.shape == (B, 3, S, S) and pred.dtype == jnp.float32
    assert mask.shape == (B, 3, S, S)
    print("KERNEL_OK")
</pallas_src>

<mosaic_0001>
module attributes {stable_mosaic.version = 11 : i64} {
  func.func @_linear_kernel(%arg0: i32, %arg1: memref<512x12xf32, #tpu.memory_space<vmem>>, %arg2: memref<12x48xbf16, #tpu.memory_space<vmem>>, %arg3: memref<1x48xf32, #tpu.memory_space<vmem>>, %arg4: memref<512x48xf32, #tpu.memory_space<vmem>>) attributes {dimension_semantics = [#tpu.dimension_semantics<parallel>], iteration_bounds = array<i64: 1>, scalar_prefetch = 0 : i64, scratch_operands = 0 : i64, tpu.core_type = #tpu.core_type<tc>, window_params = [{transform_indices = @transform_0, window_bounds = array<i64: 512, 12>}, {pipeline_mode = #tpu.pipeline_mode<synchronous>, transform_indices = @transform_1, window_bounds = array<i64: 12, 48>}, {pipeline_mode = #tpu.pipeline_mode<synchronous>, transform_indices = @transform_2, window_bounds = array<i64: 1, 48>}, {transform_indices = @transform_3, window_bounds = array<i64: 512, 48>}]} {
    %c0 = arith.constant 0 : index
    %c0_0 = arith.constant 0 : index
    %0 = vector.load %arg1[%c0, %c0_0] : memref<512x12xf32, #tpu.memory_space<vmem>>, vector<512x12xf32>
    %1 = arith.truncf %0 : vector<512x12xf32> to vector<512x12xbf16>
    %c0_1 = arith.constant 0 : index
    %c0_2 = arith.constant 0 : index
    %2 = vector.load %arg2[%c0_1, %c0_2] : memref<12x48xbf16, #tpu.memory_space<vmem>>, vector<12x48xbf16>
    %cst = arith.constant dense<0.000000e+00> : vector<512x48xf32>
    %3 = tpu.matmul %1, %2, %cst {dimension_numbers = #tpu.dot_dimension_numbers<[1], [0], [0], [1], [0, 0, 1, 1], [], []>} : vector<512x12xbf16>, vector<12x48xbf16>, vector<512x48xf32> -> vector<512x48xf32>
    %c0_3 = arith.constant 0 : index
    %c0_4 = arith.constant 0 : index
    %4 = vector.load %arg3[%c0_3, %c0_4] : memref<1x48xf32, #tpu.memory_space<vmem>>, vector<1x48xf32>
    %5 = vector.broadcast %4 : vector<1x48xf32> to vector<512x48xf32>
    %6 = arith.addf %3, %5 : vector<512x48xf32>
    %c0_5 = arith.constant 0 : index
    %c0_6 = arith.constant 0 : index
    %7 = vector.load %arg4[%c0_5, %c0_6] : memref<512x48xf32, #tpu.memory_space<vmem>>, vector<512x48xf32>
    tpu.vector_store %arg4[%c0_5, %c0_6], %6 {strides = array<i32>} : memref<512x48xf32, #tpu.memory_space<vmem>>, vector<512x48xf32>,
    return
  }
  func.func @transform_0(%arg0: i32) -> (i32, i32) {
    %c0_i32 = arith.constant 0 : i32
    %c0_i32_0 = arith.constant 0 : i32
    return %arg0, %c0_i32 : i32, i32
  }
  func.func @transform_1(%arg0: i32) -> (i32, i32) {
    %c0_i32 = arith.constant 0 : i32
    %c0_i32_0 = arith.constant 0 : i32
    %c0_i32_1 = arith.constant 0 : i32
    return %c0_i32, %c0_i32_0 : i32, i32
  }
  func.func @transform_2(%arg0: i32) -> (i32, i32) {
    %c0_i32 = arith.constant 0 : i32
    %c0_i32_0 = arith.constant 0 : i32
    %c0_i32_1 = arith.constant 0 : i32
    return %c0_i32, %c0_i32_0 : i32, i32
  }
  func.func @transform_3(%arg0: i32) -> (i32, i32) {
    %c0_i32 = arith.constant 0 : i32
    %c0_i32_0 = arith.constant 0 : i32
    return %arg0, %c0_i32 : i32, i32
  }
}

</mosaic_0001>

<bundles_post_ra>
// kernel: tpu_custom_call.1
= control target key start
LH: loop header
LB: loop body
LE: loop exit
PB: predicated region body
PF: predicated region fallthrough
CT: control target
= control target key end

     0   :  { %vm222_vm0 = vcmask 1045504   ;;  %vm125_vm1 = vcmask 97280   ;;  %vm515_vm2 = vcmask 392192   ;;  %s1294_s1 = inlined_call_operand.vmem [shape: bf16[12,48], index: 1, kind: input, shape index: {}]   ;;  %s1295_s0 = inlined_call_operand.vmem [shape: f32[512,12], index: 0, kind: input, shape index: {}]   ;;  %s1296_s2 = inlined_call_operand.vmem [shape: f32[1,48], index: 2, kind: input, shape index: {}]   ;;  %s1297_s3 = inlined_call_operand.vmem [shape: f32[512,48], index: 3, kind: output, shape index: {}]  }
   0x1   :  { %v721_v0 = vld [vmem:[%s1294_s1] sm:$0x3f]   ;;  %v16_v2 = vld [vmem:[%s1295_s0 + $0x8] sm:$0xff]  ;;  %v17_v7 = vld [vmem:[%s1295_s0 + $0x10] sm:$0xff] }
   0x2   :  { %v15_v1 = vld [vmem:[%s1295_s0] sm:$0xff]  ;;  %719 = vmatprep.subr.msk.bf16.mxu0 %vm222_vm0, %v721_v0  ;;  %720 = vmatprep.subr.msk.bf16.mxu1 %vm222_vm0, %v721_v0  ;;  %v224_v4 = vsel %vm222_vm0, %v721_v0, 0  ;;  %v48_v6 = vld [vmem:[%s1295_s0 + $0x108] sm:$0xff]  ;;  %v18_v8 = vld [vmem:[%s1295_s0 + $0x18] sm:$0xff] }
   0x3   :  { %v47_v3 = vld [vmem:[%s1295_s0 + $0x100] sm:$0xff]  ;;  %v79_v5 = vpack.c.bf16 %v16_v2, %v15_v1  ;;  %652 = vmatpush3.bf16.msra.mxu0 %v224_v4  ;;  %718 = vmatpush3.bf16.msra.mxu1 %v224_v4  ;;  %v80_v10 = vpack.c.bf16 %v18_v8, %v17_v7  ;;  %v49_v11 = vld [vmem:[%s1295_s0 + $0x110] sm:$0xff]  ;;  %v50_v12 = vld [vmem:[%s1295_s0 + $0x118] sm:$0xff] }
   0x4   :  { %v95_v9 = vpack.c.bf16 %v48_v6, %v47_v3  ;;  %v19_v13 = vld [vmem:[%s1295_s0 + $0x20] sm:$0xff]  ;;  %v96_v14 = vpack.c.bf16 %v50_v12, %v49_v11  ;;  %v20_v15 = vld [vmem:[%s1295_s0 + $0x28] sm:$0xff]  ;;  %v21_v20 = vld [vmem:[%s1295_s0 + $0x30] sm:$0xff] }
   0x5   :  { %653 = vmatprep.mubr.msk.bf16.mxu0 %vm125_vm1, %v79_v5  ;;  %v51_v16 = vld [vmem:[%s1295_s0 + $0x120] sm:$0xff]  ;;  %v52_v17 = vld [vmem:[%s1295_s0 + $0x128] sm:$0xff]  ;;  %v81_v18 = vpack.c.bf16 %v20_v15, %v19_v13  ;;  %v22_v21 = vld [vmem:[%s1295_s0 + $0x38] sm:$0xff] }
   0x6   :  { %685 = vmatprep.mubr.msk.bf16.mxu1 %vm125_vm1, %v95_v9  ;;  %v97_v19 = vpack.c.bf16 %v52_v17, %v51_v16  ;;  %654 = vmatmul.mubr.msk.bf16.vlgmr.msra.gmra.mxu0 %vm125_vm1, %v80_v10  ;;  %v53_v22 = vld [vmem:[%s1295_s0 + $0x130] sm:$0xff]  ;;  %v54_v23 = vld [vmem:[%s1295_s0 + $0x138] sm:$0xff]  ;;  %v23_v24 = vld [vmem:[%s1295_s0 + $0x40] sm:$0xff]  ;;  %v82_v28 = vpack.c.bf16 %v22_v21, %v21_v20 }
   0x7   :  { %686 = vmatmul.mubr.msk.bf16.vlgmr.msra.gmra.mxu1 %vm125_vm1, %v96_v14  ;;  %657 = vmatprep.mubr.msk.bf16.mxu0 %vm125_vm1, %v81_v18  ;;  %v24_v25 = vld [vmem:[%s1295_s0 + $0x48] sm:$0xff]  ;;  %v55_v26 = vld [vmem:[%s1295_s0 + $0x140] sm:$0xff]  ;;  %v98_v29 = vpack.c.bf16 %v54_v23, %v53_v22  ;;  %v25_v32 = vld [vmem:[%s1295_s0 + $0x50] sm:$0xff] }
   0x8   :  { %689 = vmatprep.mubr.msk.bf16.mxu1 %vm125_vm1, %v97_v19  ;;  %v56_v27 = vld [vmem:[%s1295_s0 + $0x148] sm:$0xff]  ;;  %v83_v30 = vpack.c.bf16 %v24_v25, %v23_v24  ;;  %v26_v33 = vld [vmem:[%s1295_s0 + $0x58] sm:$0xff]  ;;  %v57_v34 = vld [vmem:[%s1295_s0 + $0x150] sm:$0xff] }
   0x9   :  { %v99_v31 = vpack.c.bf16 %v56_v27, %v55_v26  ;;  %v58_v35 = vld [vmem:[%s1295_s0 + $0x158] sm:$0xff]  ;;  %v27_v36 = vld [vmem:[%s1295_s0 + $0x60] sm:$0xff]  ;;  %v28_v37 = vld [vmem:[%s1295_s0 + $0x68] sm:$0xff]  ;;  %v84_v40 = vpack.c.bf16 %v26_v33, %v25_v32 }
   0xa   :  { %v59_v38 = vld [vmem:[%s1295_s0 + $0x160] sm:$0xff]  ;;  %v60_v39 = vld [vmem:[%s1295_s0 + $0x168] sm:$0xff]  ;;  %v100_v41 = vpack.c.bf16 %v58_v35, %v57_v34  ;;  %v85_v42 = vpack.c.bf16 %v28_v37, %v27_v36  ;;  %v29_v44 = vld [vmem:[%s1295_s0 + $0x70] sm:$0xff] }
   0xb   :  { %v101_v43 = vpack.c.bf16 %v60_v39, %v59_v38  ;;  %v30_v45 = vld [vmem:[%s1295_s0 + $0x78] sm:$0xff]  ;;  %v61_v46 = vld [vmem:[%s1295_s0 + $0x170] sm:$0xff]  ;;  %v31_v48 = vld [vmem:[%s1295_s0 + $0x80] sm:$0xff] }
   0xc   :  { %v62_v47 = vld [vmem:[%s1295_s0 + $0x178] sm:$0xff]  ;;  %v32_v49 = vld [vmem:[%s1295_s0 + $0x88] sm:$0xff]  ;;  %v63_v50 = vld [vmem:[%s1295_s0 + $0x180] sm:$0xff]  ;;  %v86_v52 = vpack.c.bf16 %v30_v45, %v29_v44 }
   0xd   :  { %v64_v51 = vld [vmem:[%s1295_s0 + $0x188] sm:$0xff]  ;;  %v102_v53 = vpack.c.bf16 %v62_v47, %v61_v46  ;;  %v87_v54 = vpack.c.bf16 %v32_v49, %v31_v48  ;;  %v33_v56 = vld [vmem:[%s1295_s0 + $0x90] sm:$0xff]  ;;  %v34_v57 = vld [vmem:[%s1295_s0 + $0x98] sm:$0xff] }
   0xe   :  { %658 = vmatmul.mubr.msk.bf16.gmra.mxu0 %vm125_vm1, %v82_v28  ;;  %v103_v55 = vpack.c.bf16 %v64_v51, %v63_v50  ;;  %v65_v58 = vld [vmem:[%s1295_s0 + $0x190] sm:$0xff]  ;;  %v66_v59 = vld [vmem:[%s1295_s0 + $0x198] sm:$0xff]  ;;  %v35_v60 = vld [vmem:[%s1295_s0 + $0xa0] sm:$0xff]  ;;  %v88_v0 = vpack.c.bf16 %v34_v57, %v33_v56 }
   0xf   :  { %690 = vmatmul.mubr.msk.bf16.gmra.mxu1 %vm125_vm1, %v98_v29  ;;  %661 = vmatprep.mubr.msk.bf16.mxu0 %vm125_vm1, %v83_v30  ;;  %v36_v61 = vld [vmem:[%s1295_s0 + $0xa8] sm:$0xff]  ;;  %v67_v62 = vld [vmem:[%s1295_s0 + $0x1a0] sm:$0xff]  ;;  %v104_v1 = vpack.c.bf16 %v66_v59, %v65_v58  ;;  %v37_v4 = vld [vmem:[%s1295_s0 + $0xb0] sm:$0xff] }
  0x10   :  { %693 = vmatprep.mubr.msk.bf16.mxu1 %vm125_vm1, %v99_v31  ;;  %v68_v63 = vld [vmem:[%s1295_s0 + $0x1a8] sm:$0xff]  ;;  %v89_v2 = vpack.c.bf16 %v36_v61, %v35_v60  ;;  %v38_v5 = vld [vmem:[%s1295_s0 + $0xb8] sm:$0xff]  ;;  %v69_v6 = vld [vmem:[%s1295_s0 + $0x1b0] sm:$0xff] }
  0x11   :  { %v105_v3 = vpack.c.bf16 %v68_v63, %v67_v62  ;;  %v70_v7 = vld [vmem:[%s1295_s0 + $0x1b8] sm:$0xff]  ;;  %v39_v8 = vld [vmem:[%s1295_s0 + $0xc0] sm:$0xff]  ;;  %v40_v9 = vld [vmem:[%s1295_s0 + $0xc8] sm:$0xff]  ;;  %v90_v12 = vpack.c.bf16 %v38_v5, %v37_v4 }
  0x12   :  { %v71_v10 = vld [vmem:[%s1295_s0 + $0x1c0] sm:$0xff]  ;;  %v72_v11 = vld [vmem:[%s1295_s0 + $0x1c8] sm:$0xff]  ;;  %v106_v13 = vpack.c.bf16 %v70_v7, %v69_v6  ;;  %v91_v14 = vpack.c.bf16 %v40_v9, %v39_v8  ;;  %v41_v16 = vld [vmem:[%s1295_s0 + $0xd0] sm:$0xff] }
  0x13   :  { %v107_v15 = vpack.c.bf16 %v72_v11, %v71_v10  ;;  %v42_v17 = vld [vmem:[%s1295_s0 + $0xd8] sm:$0xff]  ;;  %v73_v18 = vld [vmem:[%s1295_s0 + $0x1d0] sm:$0xff]  ;;  %v43_v20 = vld [vmem:[%s1295_s0 + $0xe0] sm:$0xff] }
  0x14   :  { %v74_v19 = vld [vmem:[%s1295_s0 + $0x1d8] sm:$0xff]  ;;  %v44_v21 = vld [vmem:[%s1295_s0 + $0xe8] sm:$0xff]  ;;  %v75_v22 = vld [vmem:[%s1295_s0 + $0x1e0] sm:$0xff]  ;;  %v92_v24 = vpack.c.bf16 %v42_v17, %v41_v16 }
  0x15   :  { %v76_v23 = vld [vmem:[%s1295_s0 + $0x1e8] sm:$0xff]  ;;  %v108_v25 = vpack.c.bf16 %v74_v19, %v73_v18  ;;  %v93_v26 = vpack.c.bf16 %v44_v21, %v43_v20  ;;  %v45_v28 = vld [vmem:[%s1295_s0 + $0xf0] sm:$0xff]  ;;  %v46_v29 = vld [vmem:[%s1295_s0 + $0xf8] sm:$0xff] }
  0x16   :  { %662 = vmatmul.mubr.msk.bf16.gmra.mxu0 %vm125_vm1, %v84_v40  ;;  %v109_v27 = vpack.c.bf16 %v76_v23, %v75_v22  ;;  %v77_v30 = vld [vmem:[%s1295_s0 + $0x1f0] sm:$0xff]  ;;  %v78_v31 = vld [vmem:[%s1295_s0 + $0x1f8] sm:$0xff]  ;;  %v94_v32 = vpack.c.bf16 %v46_v29, %v45_v28  ;;  %v972_v34 = vld [vmem:[%s1296_s2] ss:$0 sm:$0xff] }
  0x17   :  { %694 = vmatmul.mubr.msk.bf16.gmra.mxu1 %vm125_vm1, %v100_v41  ;;  %665 = vmatprep.mubr.msk.bf16.mxu0 %vm125_vm1, %v85_v42  ;;  %v110_v33 = vpack.c.bf16 %v78_v31, %v77_v30 }
  0x18   :  { %697 = vmatprep.mubr.msk.bf16.mxu1 %vm125_vm1, %v101_v43 }
  0x1e   :  { %666 = vmatmul.mubr.msk.bf16.gmra.mxu0 %vm125_vm1, %v86_v52 }
  0x1f   :  { %698 = vmatmul.mubr.msk.bf16.gmra.mxu1 %vm125_vm1, %v102_v53  ;;  %669 = vmatprep.mubr.msk.bf16.mxu0 %vm125_vm1, %v87_v54 }
  0x20   :  { %701 = vmatprep.mubr.msk.bf16.mxu1 %vm125_vm1, %v103_v55 }
  0x26   :  { %670 = vmatmul.mubr.msk.bf16.gmra.mxu0 %vm125_vm1, %v88_v0 }
  0x27   :  { %702 = vmatmul.mubr.msk.bf16.gmra.mxu1 %vm125_vm1, %v104_v1  ;;  %673 = vmatprep.mubr.msk.bf16.mxu0 %vm125_vm1, %v89_v2 }
  0x28   :  { %705 = vmatprep.mubr.msk.bf16.mxu1 %vm125_vm1, %v105_v3 }
  0x2e   :  { %674 = vmatmul.mubr.msk.bf16.gmra.mxu0 %vm125_vm1, %v90_v12 }
  0x2f   :  { %706 = vmatmul.mubr.msk.bf16.gmra.mxu1 %vm125_vm1, %v106_v13  ;;  %677 = vmatprep.mubr.msk.bf16.mxu0 %vm125_vm1, %v91_v14 }
  0x30   :  { %709 = vmatprep.mubr.msk.bf16.mxu1 %vm125_vm1, %v107_v15 }
  0x36   :  { %678 = vmatmul.mubr.msk.bf16.gmra.mxu0 %vm125_vm1, %v92_v24 }
  0x37   :  { %710 = vmatmul.mubr.msk.bf16.gmra.mxu1 %vm125_vm1, %v108_v25  ;;  %681 = vmatprep.mubr.msk.bf16.mxu0 %vm125_vm1, %v93_v26 }
  0x38   :  { %713 = vmatprep.mubr.msk.bf16.mxu1 %vm125_vm1, %v109_v27 }
  0x3e   :  { %682 = vmatmul.mubr.msk.bf16.gmra.mxu0 %vm125_vm1, %v94_v32 }
  0x3f   :  { %714 = vmatmul.mubr.msk.bf16.gmra.mxu1 %vm125_vm1, %v110_v33 }
  0xc6   :  { %v655_v35 = vpop.f32.mrf.mxu0 }
  0xc7   :  { %v687_v36 = vpop.f32.mrf.mxu1  ;;  %v269_v37 = vadd.f32 %v655_v35, %v972_v34 }
  0xc8   :  { %v397_v38 = vadd.f32 %v687_v36, %v972_v34  ;;  %v260_v39 = vpop.f32.mrf.mxu0 }
  0xc9   :  { %v388_v40 = vpop.f32.mrf.mxu1  ;;  %518 = vst.msk [vmem:[%s1297_s3 + $0x10] sm:$0xff] %vm515_vm2, %v269_v37  ;;  %v261_v41 = vadd.f32 %v972_v34, %v260_v39 }
  0xca   :  { %550 = vst.msk [vmem:[%s1297_s3 + $0x110] sm:$0xff] %vm515_vm2, %v397_v38  ;;  %v389_v42 = vadd.f32 %v972_v34, %v388_v40  ;;  %v656_v43 = vpop.f32.mrf.mxu0 }
  0xcb   :  { %v688_v44 = vpop.f32.mrf.mxu1  ;;  %516 = vst.msk [vmem:[%s1297_s3] sm:$0xff] %vm515_vm2, %v261_v41  ;;  %v272_v45 = vadd.f32 %v656_v43, %v972_v34 }
  0xcc   :  { %548 = vst.msk [vmem:[%s1297_s3 + $0x100] sm:$0xff] %vm515_vm2, %v389_v42  ;;  %v400_v46 = vadd.f32 %v688_v44, %v972_v34  ;;  %v263_v47 = vpop.f32.mrf.mxu0 }
  0xcd   :  { %v391_v48 = vpop.f32.mrf.mxu1  ;;  %519 = vst.msk [vmem:[%s1297_s3 + $0x18] sm:$0xff] %vm515_vm2, %v272_v45  ;;  %v264_v49 = vadd.f32 %v972_v34, %v263_v47 }
  0xce   :  { %551 = vst.msk [vmem:[%s1297_s3 + $0x118] sm:$0xff] %vm515_vm2, %v400_v46  ;;  %v392_v50 = vadd.f32 %v972_v34, %v391_v48  ;;  %v659_v51 = vpop.f32.mrf.mxu0 }
  0xcf   :  { %v691_v52 = vpop.f32.mrf.mxu1  ;;  %517 = vst.msk [vmem:[%s1297_s3 + $0x8] sm:$0xff] %vm515_vm2, %v264_v49  ;;  %v285_v53 = vadd.f32 %v659_v51, %v972_v34 }
  0xd0   :  { %549 = vst.msk [vmem:[%s1297_s3 + $0x108] sm:$0xff] %vm515_vm2, %v392_v50  ;;  %v413_v54 = vadd.f32 %v691_v52, %v972_v34  ;;  %v276_v55 = vpop.f32.mrf.mxu0 }
  0xd1   :  { %v404_v56 = vpop.f32.mrf.mxu1  ;;  %522 = vst.msk [vmem:[%s1297_s3 + $0x30] sm:$0xff] %vm515_vm2, %v285_v53  ;;  %v277_v57 = vadd.f32 %v972_v34, %v276_v55 }
  0xd2   :  { %554 = vst.msk [vmem:[%s1297_s3 + $0x130] sm:$0xff] %vm515_vm2, %v413_v54  ;;  %v405_v58 = vadd.f32 %v972_v34, %v404_v56  ;;  %v660_v59 = vpop.f32.mrf.mxu0 }
  0xd3   :  { %v692_v60 = vpop.f32.mrf.mxu1  ;;  %520 = vst.msk [vmem:[%s1297_s3 + $0x20] sm:$0xff] %vm515_vm2, %v277_v57  ;;  %v288_v61 = vadd.f32 %v660_v59, %v972_v34 }
  0xd4   :  { %552 = vst.msk [vmem:[%s1297_s3 + $0x120] sm:$0xff] %vm515_vm2, %v405_v58  ;;  %v416_v62 = vadd.f32 %v692_v60, %v972_v34  ;;  %v279_v63 = vpop.f32.mrf.mxu0 }
  0xd5   :  { %v407_v0 = vpop.f32.mrf.mxu1  ;;  %523 = vst.msk [vmem:[%s1297_s3 + $0x38] sm:$0xff] %vm515_vm2, %v288_v61  ;;  %v280_v1 = vadd.f32 %v972_v34, %v279_v63 }
  0xd6   :  { %555 = vst.msk [vmem:[%s1297_s3 + $0x138] sm:$0xff] %vm515_vm2, %v416_v62  ;;  %v408_v2 = vadd.f32 %v972_v34, %v407_v0  ;;  %v663_v3 = vpop.f32.mrf.mxu0 }
  0xd7   :  { %v695_v4 = vpop.f32.mrf.mxu1  ;;  %521 = vst.msk [vmem:[%s1297_s3 + $0x28] sm:$0xff] %vm515_vm2, %v280_v1  ;;  %v301_v5 = vadd.f32 %v663_v3, %v972_v34 }
  0xd8   :  { %553 = vst.msk [vmem:[%s1297_s3 + $0x128] sm:$0xff] %vm515_vm2, %v408_v2  ;;  %v429_v6 = vadd.f32 %v695_v4, %v972_v34  ;;  %v292_v7 = vpop.f32.mrf.mxu0 }
  0xd9   :  { %v420_v8 = vpop.f32.mrf.mxu1  ;;  %526 = vst.msk [vmem:[%s1297_s3 + $0x50] sm:$0xff] %vm515_vm2, %v301_v5  ;;  %v293_v9 = vadd.f32 %v972_v34, %v292_v7 }
  0xda   :  { %558 = vst.msk [vmem:[%s1297_s3 + $0x150] sm:$0xff] %vm515_vm2, %v429_v6  ;;  %v421_v10 = vadd.f32 %v972_v34, %v420_v8  ;;  %v664_v11 = vpop.f32.mrf.mxu0 }
  0xdb   :  { %v696_v12 = vpop.f32.mrf.mxu1  ;;  %524 = vst.msk [vmem:[%s1297_s3 + $0x40] sm:$0xff] %vm515_vm2, %v293_v9  ;;  %v304_v13 = vadd.f32 %v664_v11, %v972_v34 }
  0xdc   :  { %556 = vst.msk [vmem:[%s1297_s3 + $0x140] sm:$0xff] %vm515_vm2, %v421_v10  ;;  %v432_v14 = vadd.f32 %v696_v12, %v972_v34  ;;  %v295_v15 = vpop.f32.mrf.mxu0 }
  0xdd   :  { %v423_v16 = vpop.f32.mrf.mxu1  ;;  %527 = vst.msk [vmem:[%s1297_s3 + $0x58] sm:$0xff] %vm515_vm2, %v304_v13  ;;  %v296_v17 = vadd.f32 %v972_v34, %v295_v15 }
  0xde   :  { %559 = vst.msk [vmem:[%s1297_s3 + $0x158] sm:$0xff] %vm515_vm2, %v432_v14  ;;  %v424_v18 = vadd.f32 %v972_v34, %v423_v16  ;;  %v667_v19 = vpop.f32.mrf.mxu0 }
  0xdf   :  { %v699_v20 = vpop.f32.mrf.mxu1  ;;  %525 = vst.msk [vmem:[%s1297_s3 + $0x48] sm:$0xff] %vm515_vm2, %v296_v17  ;;  %v317_v21 = vadd.f32 %v667_v19, %v972_v34 }
  0xe0   :  { %557 = vst.msk [vmem:[%s1297_s3 + $0x148] sm:$0xff] %vm515_vm2, %v424_v18  ;;  %v445_v22 = vadd.f32 %v699_v20, %v972_v34  ;;  %v308_v23 = vpop.f32.mrf.mxu0 }
  0xe1   :  { %v436_v24 = vpop.f32.mrf.mxu1  ;;  %530 = vst.msk [vmem:[%s1297_s3 + $0x70] sm:$0xff] %vm515_vm2, %v317_v21  ;;  %v309_v25 = vadd.f32 %v972_v34, %v308_v23 }
  0xe2   :  { %562 = vst.msk [vmem:[%s1297_s3 + $0x170] sm:$0xff] %vm515_vm2, %v445_v22  ;;  %v437_v26 = vadd.f32 %v972_v34, %v436_v24  ;;  %v668_v27 = vpop.f32.mrf.mxu0 }
  0xe3   :  { %v700_v28 = vpop.f32.mrf.mxu1  ;;  %528 = vst.msk [vmem:[%s1297_s3 + $0x60] sm:$0xff] %vm515_vm2, %v309_v25  ;;  %v320_v29 = vadd.f32 %v668_v27, %v972_v34 }
  0xe4   :  { %560 = vst.msk [vmem:[%s1297_s3 + $0x160] sm:$0xff] %vm515_vm2, %v437_v26  ;;  %v448_v30 = vadd.f32 %v700_v28, %v972_v34  ;;  %v311_v31 = vpop.f32.mrf.mxu0 }
  0xe5   :  { %v439_v32 = vpop.f32.mrf.mxu1  ;;  %531 = vst.msk [vmem:[%s1297_s3 + $0x78] sm:$0xff] %vm515_vm2, %v320_v29  ;;  %v312_v33 = vadd.f32 %v972_v34, %v311_v31 }
  0xe6   :  { %563 = vst.msk [vmem:[%s1297_s3 + $0x178] sm:$0xff] %vm515_vm2, %v448_v30  ;;  %v440_v35 = vadd.f32 %v972_v34, %v439_v32  ;;  %v671_v36 = vpop.f32.mrf.mxu0 }
  0xe7   :  { %v703_v37 = vpop.f32.mrf.mxu1  ;;  %529 = vst.msk [vmem:[%s1297_s3 + $0x68] sm:$0xff] %vm515_vm2, %v312_v33  ;;  %v333_v38 = vadd.f32 %v671_v36, %v972_v34 }
  0xe8   :  { %561 = vst.msk [vmem:[%s1297_s3 + $0x168] sm:$0xff] %vm515_vm2, %v440_v35  ;;  %v461_v39 = vadd.f32 %v703_v37, %v972_v34  ;;  %v324_v40 = vpop.f32.mrf.mxu0 }
  0xe9   :  { %v452_v41 = vpop.f32.mrf.mxu1  ;;  %534 = vst.msk [vmem:[%s1297_s3 + $0x90] sm:$0xff] %vm515_vm2, %v333_v38  ;;  %v325_v42 = vadd.f32 %v972_v34, %v324_v40 }
  0xea   :  { %566 = vst.msk [vmem:[%s1297_s3 + $0x190] sm:$0xff] %vm515_vm2, %v461_v39  ;;  %v453_v43 = vadd.f32 %v972_v34, %v452_v41  ;;  %v672_v44 = vpop.f32.mrf.mxu0 }
  0xeb   :  { %v704_v45 = vpop.f32.mrf.mxu1  ;;  %532 = vst.msk [vmem:[%s1297_s3 + $0x80] sm:$0xff] %vm515_vm2, %v325_v42  ;;  %v336_v46 = vadd.f32 %v672_v44, %v972_v34 }
  0xec   :  { %564 = vst.msk [vmem:[%s1297_s3 + $0x180] sm:$0xff] %vm515_vm2, %v453_v43  ;;  %v464_v47 = vadd.f32 %v704_v45, %v972_v34  ;;  %v327_v48 = vpop.f32.mrf.mxu0 }
  0xed   :  { %v455_v49 = vpop.f32.mrf.mxu1  ;;  %535 = vst.msk [vmem:[%s1297_s3 + $0x98] sm:$0xff] %vm515_vm2, %v336_v46  ;;  %v328_v50 = vadd.f32 %v972_v34, %v327_v48 }
  0xee   :  { %567 = vst.msk [vmem:[%s1297_s3 + $0x198] sm:$0xff] %vm515_vm2, %v464_v47  ;;  %v456_v51 = vadd.f32 %v972_v34, %v455_v49  ;;  %v675_v52 = vpop.f32.mrf.mxu0 }
  0xef   :  { %v707_v53 = vpop.f32.mrf.mxu1  ;;  %533 = vst.msk [vmem:[%s1297_s3 + $0x88] sm:$0xff] %vm515_vm2, %v328_v50  ;;  %v349_v54 = vadd.f32 %v675_v52, %v972_v34 }
  0xf0   :  { %565 = vst.msk [vmem:[%s1297_s3 + $0x188] sm:$0xff] %vm515_vm2, %v456_v51  ;;  %v477_v55 = vadd.f32 %v707_v53, %v972_v34  ;;  %v340_v56 = vpop.f32.mrf.mxu0 }
  0xf1   :  { %v468_v57 = vpop.f32.mrf.mxu1  ;;  %538 = vst.msk [vmem:[%s1297_s3 + $0xb0] sm:$0xff] %vm515_vm2, %v349_v54  ;;  %v341_v58 = vadd.f32 %v972_v34, %v340_v56 }
  0xf2   :  { %570 = vst.msk [vmem:[%s1297_s3 + $0x1b0] sm:$0xff] %vm515_vm2, %v477_v55  ;;  %v469_v59 = vadd.f32 %v972_v34, %v468_v57  ;;  %v676_v60 = vpop.f32.mrf.mxu0 }
  0xf3   :  { %v708_v61 = vpop.f32.mrf.mxu1  ;;  %536 = vst.msk [vmem:[%s1297_s3 + $0xa0] sm:$0xff] %vm515_vm2, %v341_v58  ;;  %v352_v62 = vadd.f32 %v676_v60, %v972_v34 }
  0xf4   :  { %568 = vst.msk [vmem:[%s1297_s3 + $0x1a0] sm:$0xff] %vm515_vm2, %v469_v59  ;;  %v480_v63 = vadd.f32 %v708_v61, %v972_v34  ;;  %v343_v0 = vpop.f32.mrf.mxu0 }
  0xf5   :  { %v471_v1 = vpop.f32.mrf.mxu1  ;;  %539 = vst.msk [vmem:[%s1297_s3 + $0xb8] sm:$0xff] %vm515_vm2, %v352_v62  ;;  %v344_v2 = vadd.f32 %v972_v34, %v343_v0 }
  0xf6   :  { %571 = vst.msk [vmem:[%s1297_s3 + $0x1b8] sm:$0xff] %vm515_vm2, %v480_v63  ;;  %v472_v3 = vadd.f32 %v972_v34, %v471_v1  ;;  %v679_v4 = vpop.f32.mrf.mxu0 }
  0xf7   :  { %v711_v5 = vpop.f32.mrf.mxu1  ;;  %537 = vst.msk [vmem:[%s1297_s3 + $0xa8] sm:$0xff] %vm515_vm2, %v344_v2  ;;  %v365_v6 = vadd.f32 %v679_v4, %v972_v34 }
  0xf8   :  { %569 = vst.msk [vmem:[%s1297_s3 + $0x1a8] sm:$0xff] %vm515_vm2, %v472_v3  ;;  %v493_v7 = vadd.f32 %v711_v5, %v972_v34  ;;  %v356_v8 = vpop.f32.mrf.mxu0 }
  0xf9   :  { %v484_v9 = vpop.f32.mrf.mxu1  ;;  %542 = vst.msk [vmem:[%s1297_s3 + $0xd0] sm:$0xff] %vm515_vm2, %v365_v6  ;;  %v357_v10 = vadd.f32 %v972_v34, %v356_v8 }
  0xfa   :  { %574 = vst.msk [vmem:[%s1297_s3 + $0x1d0] sm:$0xff] %vm515_vm2, %v493_v7  ;;  %v485_v11 = vadd.f32 %v972_v34, %v484_v9  ;;  %v680_v12 = vpop.f32.mrf.mxu0 }
  0xfb   :  { %v712_v13 = vpop.f32.mrf.mxu1  ;;  %540 = vst.msk [vmem:[%s1297_s3 + $0xc0] sm:$0xff] %vm515_vm2, %v357_v10  ;;  %v368_v14 = vadd.f32 %v680_v12, %v972_v34 }
  0xfc   :  { %572 = vst.msk [vmem:[%s1297_s3 + $0x1c0] sm:$0xff] %vm515_vm2, %v485_v11  ;;  %v496_v15 = vadd.f32 %v712_v13, %v972_v34  ;;  %v359_v16 = vpop.f32.mrf.mxu0 }
  0xfd   :  { %v487_v17 = vpop.f32.mrf.mxu1  ;;  %543 = vst.msk [vmem:[%s1297_s3 + $0xd8] sm:$0xff] %vm515_vm2, %v368_v14  ;;  %v360_v18 = vadd.f32 %v972_v34, %v359_v16 }
  0xfe   :  { %575 = vst.msk [vmem:[%s1297_s3 + $0x1d8] sm:$0xff] %vm515_vm2, %v496_v15  ;;  %v488_v19 = vadd.f32 %v972_v34, %v487_v17  ;;  %v683_v20 = vpop.f32.mrf.mxu0 }
  0xff   :  { %v715_v21 = vpop.f32.mrf.mxu1  ;;  %541 = vst.msk [vmem:[%s1297_s3 + $0xc8] sm:$0xff] %vm515_vm2, %v360_v18  ;;  %v381_v22 = vadd.f32 %v683_v20, %v972_v34 }
 0x100   :  { %573 = vst.msk [vmem:[%s1297_s3 + $0x1c8] sm:$0xff] %vm515_vm2, %v488_v19  ;;  %v509_v23 = vadd.f32 %v715_v21, %v972_v34  ;;  %v372_v24 = vpop.f32.mrf.mxu0 }
 0x101   :  { %v500_v25 = vpop.f32.mrf.mxu1  ;;  %546 = vst.msk [vmem:[%s1297_s3 + $0xf0] sm:$0xff] %vm515_vm2, %v381_v22  ;;  %v373_v26 = vadd.f32 %v972_v34, %v372_v24 }
 0x102   :  { %578 = vst.msk [vmem:[%s1297_s3 + $0x1f0] sm:$0xff] %vm515_vm2, %v509_v23  ;;  %v501_v27 = vadd.f32 %v972_v34, %v500_v25  ;;  %v684_v28 = vpop.f32.mrf.mxu0 }
 0x103   :  { %v716_v29 = vpop.f32.mrf.mxu1  ;;  %544 = vst.msk [vmem:[%s1297_s3 + $0xe0] sm:$0xff] %vm515_vm2, %v373_v26  ;;  %v384_v30 = vadd.f32 %v684_v28, %v972_v34 }
 0x104   :  { %576 = vst.msk [vmem:[%s1297_s3 + $0x1e0] sm:$0xff] %vm515_vm2, %v501_v27  ;;  %v512_v31 = vadd.f32 %v716_v29, %v972_v34  ;;  %v375_v32 = vpop.f32.mrf.mxu0 }
 0x105   :  { %v503_v33 = vpop.f32.mrf.mxu1  ;;  %547 = vst.msk [vmem:[%s1297_s3 + $0xf8] sm:$0xff] %vm515_vm2, %v384_v30  ;;  %v376_v35 = vadd.f32 %v972_v34, %v375_v32 }
 0x106   :  { %579 = vst.msk [vmem:[%s1297_s3 + $0x1f8] sm:$0xff] %vm515_vm2, %v512_v31  ;;  %v504_v36 = vadd.f32 %v972_v34, %v503_v33 }
 0x107   :  { %545 = vst.msk [vmem:[%s1297_s3 + $0xe8] sm:$0xff] %vm515_vm2, %v376_v35 }
 0x108   :  { %577 = vst.msk [vmem:[%s1297_s3 + $0x1e8] sm:$0xff] %vm515_vm2, %v504_v36 }

</bundles_post_ra>
